<compile_context>
chip_gen: v5e
topology: v5e:2x2
jax: 0.10.0
libtpu: 0.0.40
codegen_flags: <defaults>
</compile_context>

<pallas_src>
import functools

import jax
import jax.numpy as jnp
from jax import lax
from jax.experimental import pallas as pl
from jax.experimental.pallas import tpu as pltpu

_LANES = 128
_MAX_ROW_TILE = 2048   # 2048 x 128 x 4B = 1 MiB f32 per input per block
_N_SPLITS = 2          # shard row range across TensorCores (v7x megacore)


def _sumsq_kernel(yhat_ref, y_ref, out_ref, acc_ref, *,
                  n_elems, row_tile, tiles_per_split):
    s = pl.program_id(0)                     # core-split index ("parallel")
    t = pl.program_id(1)                     # row-tile index   ("arbitrary")
    block_elems = row_tile * _LANES
    block_idx = s * tiles_per_split + t      # logical (unclamped) block id
    # Blocks [0, n_full_blocks) are fully inside the valid element range.
    n_full_blocks = n_elems // block_elems

    @pl.when(t == 0)
    def _():
        acc_ref[...] = jnp.zeros_like(acc_ref)

    def _diff():
        return yhat_ref[...].astype(jnp.float32) - y_ref[...].astype(jnp.float32)

    # Hot path: fully-valid block -> pure elementwise VPU work.
    @pl.when(block_idx < n_full_blocks)
    def _():
        d = _diff()
        acc_ref[...] += d * d

    # Cold path: last (partial) block, lane-pad tail, or phantom blocks of the
    # second split -> mask BEFORE squaring so garbage never enters the sum.
    # (Assumes n_elems < 2**31 so int32 element indices do not overflow.)
    @pl.when(block_idx >= n_full_blocks)
    def _():
        d = _diff()
        row_iota = lax.broadcasted_iota(jnp.int32, (row_tile, _LANES), 0)
        lane_iota = lax.broadcasted_iota(jnp.int32, (row_tile, _LANES), 1)
        idx = block_idx * block_elems + row_iota * _LANES + lane_iota
        d = jnp.where(idx < n_elems, d, jnp.float32(0.0))
        acc_ref[...] += d * d

    # Single cross-lane reduce per split, only in the epilogue.
    @pl.when(t == pl.num_programs(1) - 1)
    def _():
        out_ref[0, 0] = jnp.sum(acc_ref[...])


def rmse_loss(yhat, y, eps=1e-08):
    assert yhat.shape == y.shape, "yhat and y must have the same shape"
    n_elems = yhat.size

    # Flatten in the original dtype (reshape of a contiguous array is free).
    flat_yhat = yhat.reshape(-1)
    flat_y = y.reshape(-1)

    # Only pad when numel is not lane-divisible (pad values are masked out
    # in-kernel, and padded positions also cancel as (0-0)^2 = 0).
    padded = pl.cdiv(n_elems, _LANES) * _LANES
    if padded != n_elems:
        flat_yhat = jnp.pad(flat_yhat, (0, padded - n_elems))
        flat_y = jnp.pad(flat_y, (0, padded - n_elems))
    rows = padded // _LANES
    yhat2d = flat_yhat.reshape(rows, _LANES)
    y2d = flat_y.reshape(rows, _LANES)

    if rows <= _MAX_ROW_TILE:
        row_tile = rows            # full-extent block: always layout-legal
    else:
        row_tile = _MAX_ROW_TILE   # multiple of 32: legal for any dtype
    num_row_tiles = pl.cdiv(rows, row_tile)
    splits = _N_SPLITS if num_row_tiles >= _N_SPLITS else 1
    tiles_per_split = pl.cdiv(num_row_tiles, splits)

    def in_map(s, t):
        # Clamp phantom trailing blocks of the last split into range; their
        # contribution is masked to zero inside the kernel.
        return (jnp.minimum(s * tiles_per_split + t, num_row_tiles - 1), 0)

    partials = pl.pallas_call(
        functools.partial(_sumsq_kernel, n_elems=n_elems, row_tile=row_tile,
                          tiles_per_split=tiles_per_split),
        out_shape=jax.ShapeDtypeStruct((splits, 1), jnp.float32),
        grid_spec=pltpu.PrefetchScalarGridSpec(
            num_scalar_prefetch=0,
            grid=(splits, tiles_per_split),
            in_specs=[
                pl.BlockSpec((row_tile, _LANES), in_map),
                pl.BlockSpec((row_tile, _LANES), in_map),
            ],
            out_specs=pl.BlockSpec((1, 1), lambda s, t: (s, 0),
                                   memory_space=pltpu.SMEM),
            scratch_shapes=[pltpu.VMEM((row_tile, _LANES), jnp.float32)],
        ),
        compiler_params=pltpu.CompilerParams(
            dimension_semantics=("parallel", "arbitrary")),
    )(yhat2d, y2d)

    # Tiny final combine (<= `splits` scalars): sum partials, mean, sqrt(+eps).
    total = jnp.sum(partials)
    return jnp.sqrt(total / jnp.float32(n_elems) + jnp.float32(eps))


def _reference(yhat, y, eps=1e-08):
    d = yhat.astype(jnp.float32) - y.astype(jnp.float32)
    return jnp.sqrt(jnp.mean(d * d) + jnp.float32(eps))


if __name__ == "__main__":
    key = jax.random.PRNGKey(0)

    # Primary case matching the module's implied NCHW usage.
    k1, k2, key = (*jax.random.split(key, 2), key)
    shape = (2, 4, 16, 16)
    yhat = jax.random.normal(k1, shape, dtype=jnp.float32)
    y = jax.random.normal(k2, shape, dtype=jnp.float32)
    loss = rmse_loss(yhat, y)
    jax.block_until_ready(loss)
    ref = _reference(yhat, y)
    assert jnp.allclose(loss, ref, rtol=1e-6, atol=1e-6), (loss, ref)

    # Ragged element count (exercises in-kernel tail masking).
    k1, k2, key = (*jax.random.split(key, 2), key)
    yhat = jax.random.normal(k1, (3, 5, 7, 11), dtype=jnp.float32)
    y = jax.random.normal(k2, (3, 5, 7, 11), dtype=jnp.float32)
    loss = rmse_loss(yhat, y)
    jax.block_until_ready(loss)
    assert jnp.allclose(loss, _reference(yhat, y), rtol=1e-6, atol=1e-6)

    # Multi-tile case with odd tile count (exercises the 2-way core split,
    # large-tile path, and the clamped phantom block).
    k1, k2, key = (*jax.random.split(key, 2), key)
    yhat = jax.random.normal(k1, (9, 64, 32, 32), dtype=jnp.float32)
    y = jax.random.normal(k2, (9, 64, 32, 32), dtype=jnp.float32)
    loss = rmse_loss(yhat, y)
    jax.block_until_ready(loss)
    assert jnp.allclose(loss, _reference(yhat, y), rtol=1e-5, atol=1e-6)

    print("KERNEL_OK")
</pallas_src>

<mosaic_0001>
module attributes {stable_mosaic.version = 11 : i64} {
  func.func @_sumsq_kernel(%arg0: i32, %arg1: i32, %arg2: memref<16x128xf32, #tpu.memory_space<vmem>>, %arg3: memref<16x128xf32, #tpu.memory_space<vmem>>, %arg4: memref<1x1xf32, #tpu.memory_space<smem>>, %arg5: memref<16x128xf32, #tpu.memory_space<vmem>>) attributes {dimension_semantics = [#tpu.dimension_semantics<parallel>, #tpu.dimension_semantics<arbitrary>], iteration_bounds = array<i64: 1, 1>, scalar_prefetch = 0 : i64, scratch_operands = 1 : i64, tpu.core_type = #tpu.core_type<tc>, window_params = [{transform_indices = @transform_0, window_bounds = array<i64: 16, 128>}, {transform_indices = @transform_1, window_bounds = array<i64: 16, 128>}, {transform_indices = @transform_2, window_bounds = array<i64: 1, 1>}]} {
    %c1_i32 = arith.constant 1 : i32
    %0 = arith.muli %arg0, %c1_i32 : i32
    %1 = arith.addi %0, %arg1 : i32
    %c0_i32 = arith.constant 0 : i32
    %2 = arith.cmpi eq, %arg1, %c0_i32 : i32
    %3 = arith.extui %2 : i1 to i32
    %c0_i32_0 = arith.constant 0 : i32
    %4 = arith.cmpi ne, %3, %c0_i32_0 : i32
    scf.if %4 {
      %cst = arith.constant 0.000000e+00 : f32
      %14 = vector.broadcast %cst : f32 to vector<16x128xf32>
      %c0 = arith.constant 0 : index
      %c0_7 = arith.constant 0 : index
      %15 = vector.load %arg5[%c0, %c0_7] : memref<16x128xf32, #tpu.memory_space<vmem>>, vector<16x128xf32>
      tpu.vector_store %arg5[%c0, %c0_7], %14 {strides = array<i32>} : memref<16x128xf32, #tpu.memory_space<vmem>>, vector<16x128xf32>,
    } else {
    }
    %c1_i32_1 = arith.constant 1 : i32
    %5 = arith.cmpi slt, %1, %c1_i32_1 : i32
    %6 = arith.extui %5 : i1 to i32
    %c0_i32_2 = arith.constant 0 : i32
    %7 = arith.cmpi ne, %6, %c0_i32_2 : i32
    scf.if %7 {
      %c0 = arith.constant 0 : index
      %c0_7 = arith.constant 0 : index
      %14 = vector.load %arg2[%c0, %c0_7] : memref<16x128xf32, #tpu.memory_space<vmem>>, vector<16x128xf32>
      %c0_8 = arith.constant 0 : index
      %c0_9 = arith.constant 0 : index
      %15 = vector.load %arg3[%c0_8, %c0_9] : memref<16x128xf32, #tpu.memory_space<vmem>>, vector<16x128xf32>
      %16 = arith.subf %14, %15 : vector<16x128xf32>
      %c0_10 = arith.constant 0 : index
      %c0_11 = arith.constant 0 : index
      %17 = vector.load %arg5[%c0_10, %c0_11] : memref<16x128xf32, #tpu.memory_space<vmem>>, vector<16x128xf32>
      %18 = arith.mulf %16, %16 : vector<16x128xf32>
      %19 = arith.addf %17, %18 : vector<16x128xf32>
      %c0_12 = arith.constant 0 : index
      %c0_13 = arith.constant 0 : index
      %20 = vector.load %arg5[%c0_12, %c0_13] : memref<16x128xf32, #tpu.memory_space<vmem>>, vector<16x128xf32>
      tpu.vector_store %arg5[%c0_12, %c0_13], %19 {strides = array<i32>} : memref<16x128xf32, #tpu.memory_space<vmem>>, vector<16x128xf32>,
    } else {
    }
    %c1_i32_3 = arith.constant 1 : i32
    %8 = arith.cmpi sge, %1, %c1_i32_3 : i32
    %9 = arith.extui %8 : i1 to i32
    %c0_i32_4 = arith.constant 0 : i32
    %10 = arith.cmpi ne, %9, %c0_i32_4 : i32
    scf.if %10 {
      %c0 = arith.constant 0 : index
      %c0_7 = arith.constant 0 : index
      %14 = vector.load %arg2[%c0, %c0_7] : memref<16x128xf32, #tpu.memory_space<vmem>>, vector<16x128xf32>
      %c0_8 = arith.constant 0 : index
      %c0_9 = arith.constant 0 : index
      %15 = vector.load %arg3[%c0_8, %c0_9] : memref<16x128xf32, #tpu.memory_space<vmem>>, vector<16x128xf32>
      %16 = arith.subf %14, %15 : vector<16x128xf32>
      %17 = tpu.iota {dimensions = array<i32: 0>} : vector<16x128xi32>
      %18 = tpu.iota {dimensions = array<i32: 1>} : vector<16x128xi32>
      %c2048_i32 = arith.constant 2048 : i32
      %19 = arith.muli %1, %c2048_i32 : i32
      %c128_i32 = arith.constant 128 : i32
      %20 = vector.broadcast %c128_i32 : i32 to vector<16x128xi32>
      %21 = arith.muli %17, %20 : vector<16x128xi32>
      %22 = vector.broadcast %19 : i32 to vector<16x128xi32>
      %23 = arith.addi %22, %21 : vector<16x128xi32>
      %24 = arith.addi %23, %18 : vector<16x128xi32>
      %c2048_i32_10 = arith.constant 2048 : i32
      %25 = vector.broadcast %c2048_i32_10 : i32 to vector<16x128xi32>
      %26 = arith.cmpi slt, %24, %25 : vector<16x128xi32>
      %cst = arith.constant 0.000000e+00 : f32
      %27 = vector.broadcast %cst : f32 to vector<16x128xf32>
      %28 = arith.select %26, %16, %27 : vector<16x128xi1>, vector<16x128xf32>
      %c0_11 = arith.constant 0 : index
      %c0_12 = arith.constant 0 : index
      %29 = vector.load %arg5[%c0_11, %c0_12] : memref<16x128xf32, #tpu.memory_space<vmem>>, vector<16x128xf32>
      %30 = arith.mulf %28, %28 : vector<16x128xf32>
      %31 = arith.addf %29, %30 : vector<16x128xf32>
      %c0_13 = arith.constant 0 : index
      %c0_14 = arith.constant 0 : index
      %32 = vector.load %arg5[%c0_13, %c0_14] : memref<16x128xf32, #tpu.memory_space<vmem>>, vector<16x128xf32>
      tpu.vector_store %arg5[%c0_13, %c0_14], %31 {strides = array<i32>} : memref<16x128xf32, #tpu.memory_space<vmem>>, vector<16x128xf32>,
    } else {
    }
    %c0_i32_5 = arith.constant 0 : i32
    %11 = arith.cmpi eq, %arg1, %c0_i32_5 : i32
    %12 = arith.extui %11 : i1 to i32
    %c0_i32_6 = arith.constant 0 : i32
    %13 = arith.cmpi ne, %12, %c0_i32_6 : i32
    scf.if %13 {
      %c0 = arith.constant 0 : index
      %c0_7 = arith.constant 0 : index
      %14 = vector.load %arg5[%c0, %c0_7] : memref<16x128xf32, #tpu.memory_space<vmem>>, vector<16x128xf32>
      %15 = vector.shape_cast %14 : vector<16x128xf32> to vector<1x16x128xf32>
      %cst = arith.constant dense<0.000000e+00> : vector<1xf32>
      %16 = vector.multi_reduction <add>, %15, %cst [1, 2] : vector<1x16x128xf32> to vector<1xf32>
      %17 = vector.shape_cast %16 : vector<1xf32> to vector<1x1x1xf32>
      %18 = vector.extract %17[0, 0, 0] : f32 from vector<1x1x1xf32>
      %c0_8 = arith.constant 0 : index
      %c0_9 = arith.constant 0 : index
      %19 = memref.load %arg4[%c0_8, %c0_9] : memref<1x1xf32, #tpu.memory_space<smem>>
      memref.store %18, %arg4[%c0_8, %c0_9] : memref<1x1xf32, #tpu.memory_space<smem>>
    } else {
    }
    return
  }
  func.func @transform_0(%arg0: i32, %arg1: i32) -> (i32, i32) {
    %c1_i32 = arith.constant 1 : i32
    %0 = arith.muli %arg0, %c1_i32 : i32
    %1 = arith.addi %0, %arg1 : i32
    %c0_i32 = arith.constant 0 : i32
    %2 = arith.minsi %1, %c0_i32 : i32
    %c0_i32_0 = arith.constant 0 : i32
    %c0_i32_1 = arith.constant 0 : i32
    return %2, %c0_i32_0 : i32, i32
  }
  func.func @transform_1(%arg0: i32, %arg1: i32) -> (i32, i32) {
    %c1_i32 = arith.constant 1 : i32
    %0 = arith.muli %arg0, %c1_i32 : i32
    %1 = arith.addi %0, %arg1 : i32
    %c0_i32 = arith.constant 0 : i32
    %2 = arith.minsi %1, %c0_i32 : i32
    %c0_i32_0 = arith.constant 0 : i32
    %c0_i32_1 = arith.constant 0 : i32
    return %2, %c0_i32_0 : i32, i32
  }
  func.func @transform_2(%arg0: i32, %arg1: i32) -> (i32, i32) {
    %c0_i32 = arith.constant 0 : i32
    %c0_i32_0 = arith.constant 0 : i32
    return %arg0, %c0_i32 : i32, i32
  }
}

</mosaic_0001>

<bundles_post_ra>
// kernel: tpu_custom_call.1
= control target key start
LH: loop header
LB: loop body
LE: loop exit
PB: predicated region body
PF: predicated region fallthrough
CT: control target
= control target key end

     0   :  { %7 = vsyncpa [#allocation4], 0  ;;  %s264_s0 = inlined_call_operand.hbm [shape: f32[16,128], index: 0, kind: input, shape index: {}]   ;;  %s265_s1 = inlined_call_operand.hbm [shape: f32[16,128], index: 1, kind: input, shape index: {}]   ;;  %s266_s2 = inlined_call_operand.hbm [shape: f32[1,1], index: 2, kind: output, shape index: {}]  }
   0x1   :  { %8 = vsyncpa [#allocation7], 0 }
   0x2   :  { %9 = vsyncpa [#allocation5], 0  ;;  %s20_s11 = sshll.u32 %s264_s0, 4  ;;  %s235_s12 = smov [#allocation3]   ;;  %s21_s11 = int_to_ptr.hbm [resolvable:$true] %s20_s11 }
   0x3   :  { %s22_s13 = sshll.u32 %s235_s12, 4  ;;  %s39_s16 = sshll.u32 %s265_s1, 4  ;;  %s23_s13 = int_to_ptr.vmem [resolvable:$true] %s22_s13  ;;  %s40_s16 = int_to_ptr.hbm [resolvable:$true] %s39_s16 }
   0x4   :  { %s236_s17 = smov 128   ;;  %s237_s18 = smov 8  }
   0x5   :  { %28 = dma.hbm_to_vmem [thread:$0]  %s21_s11, 256, %s23_s13, [#allocation4], %s236_s17, %s236_s17, %s237_s18  }
   0x6   :  { %s238_s19 = smov [#allocation6]  }
   0x7   :  { %s41_s20 = sshll.u32 %s238_s19, 4  ;;  %s42_s20 = int_to_ptr.vmem [resolvable:$true] %s41_s20 }
   0x8   :  { %47 = dma.hbm_to_vmem [thread:$0]  %s40_s16, 256, %s42_s20, [#allocation7], %s236_s17, %s236_s17, %s237_s18  }
   0x9   :  { %229 = dma.done.wait [#allocation4], 256  }
   0xa   :  { %230 = vsyncadd [#allocation4], 4294967040 }
   0xb   :  { %231 = dma.done.wait [#allocation7], 256  }
   0xc   :  { %232 = vsyncadd [#allocation7], 4294967040  ;;  %v75_v0 = vld [vmem:[#allocation3] sm:$0xff]  ;;  %v76_v1 = vld [vmem:[#allocation3 + $0x8] sm:$0xff]  ;;  %s146_s21 = sshll.u32 %s266_s2, 4  ;;  %s239_s23 = smov [#allocation8]   ;;  %s147_s21 = int_to_ptr.hbm [resolvable:$true] %s146_s21 }
   0xd   :  { %v77_v2 = vld [vmem:[#allocation6] sm:$0xff]  ;;  %v78_v3 = vld [vmem:[#allocation6 + $0x8] sm:$0xff] }
   0xe   :  { %v79_v4 = vsub.f32 %v75_v0, %v77_v2  ;;  %v80_v5 = vsub.f32 %v76_v1, %v78_v3 }
  0x10   :  { %v83_v6 = vmul.f32 %v79_v4, %v79_v4  ;;  %v84_v7 = vmul.f32 %v80_v5, %v80_v5 }
  0x12   :  { %v129_v8 = vadd.f32 %v84_v7, %v83_v6 }
  0x14   :  { %130 = vadd.xlane.f32.xlu0 %v129_v8 }
  0x87   :  { %v131_v9 = vpop.xlane.xlu0 %130 }
  0x88   :  { %v132_v10 = vrot.slane %v131_v9, 4 }
  0x8a   :  { %v133_v11 = vadd.f32 %v132_v10, %v131_v9 }
  0x8c   :  { %v134_v12 = vrot.slane %v133_v11, 2 }
  0x8e   :  { %v135_v13 = vadd.f32 %v134_v12, %v133_v11 }
  0x90   :  { %v136_v14 = vrot.slane %v135_v13, 1 }
  0x92   :  { %v137_v15 = vadd.f32 %v136_v14, %v135_v13 }
  0x94   :  { %162 = vpush %v137_v15 }
  0xc5   :  { %s163_s22 = spop %162 }
  0xc6   :  { %140 = sst [smem:[#allocation8]] %s163_s22 }
  0xc7   :  { %149 = dma.smem_to_hbm %s239_s23, 16, %s147_s21, [#allocation5]  }
  0xc8   :  { %233 = dma.done.wait [#allocation5], 16  }
  0xc9   :  { %234 = vsyncadd [#allocation5], 4294967280 }
  0xca   :  { %154 = sfence }
  0xcb   :  { %155 = vsyncpa [#allocation4], 1 }
  0xcc   :  { %156 = vsyncpa [#allocation7], 1 }
  0xcd   :  { %157 = vsyncpa [#allocation5], 1 }

</bundles_post_ra>
